<compile_context>
chip_gen: v7x
topology: tpu7x:2x2x1
jax: 0.10.0
libtpu: 0.0.40
codegen_flags: <defaults>
</compile_context>

<pallas_src>
import functools

import jax
import jax.numpy as jnp
from jax import lax
from jax.experimental import pallas as pl
from jax.experimental.pallas import tpu as pltpu


def _dilated_layer_kernel(x_ref, mask_ref, wd_ref, bd_ref, w1_ref, b1_ref,
                          o_ref, *, dilation):
    """One grid step: Nb batch elements, full (C, T) tiles."""
    Nb, C, T = x_ref.shape
    d = dilation
    mxu_dt = wd_ref.dtype  # bf16 (f32 accumulation requested on the dots)

    for b in range(Nb):  # static unroll; Nb is small
        xf = x_ref[b]                         # (C, T) f32 — residual + conv input
        xq = xf.astype(mxu_dt)

        # Dilated k=3 conv taps as shifted copies (zero-padded at the edges),
        # stacked along sublanes -> single K = 3*C matmul.
        z = jnp.zeros((C, d), mxu_dt)
        x_m = jnp.concatenate([z, xq[:, :T - d]], axis=1)   # tap k=0: x[t - d]
        x_p = jnp.concatenate([xq[:, d:], z], axis=1)       # tap k=2: x[t + d]
        xs = jnp.concatenate([x_m, xq, x_p], axis=0)        # (3C, T)

        h = jnp.dot(wd_ref[...], xs, preferred_element_type=jnp.float32)
        h = jnp.maximum(h + bd_ref[...], 0.0)               # bias + ReLU (f32)

        out = jnp.dot(w1_ref[...], h.astype(mxu_dt),
                      preferred_element_type=jnp.float32) + b1_ref[...]

        o_ref[b] = ((xf + out) * mask_ref[b]).astype(o_ref.dtype)


def dilated_layer(x, mask, wd, bd, w1, b1, *, dilation, batch_block=None,
                  mxu_dtype=jnp.bfloat16):
    """x: (N, C, T) f32; mask: (N, M, T) f32 (channel 0 used).

    wd: (Cout, Cin, 3) PyTorch Conv1d weight layout; bd: (Cout,)
    w1: (Cout, Cout) 1x1 conv weight (kernel dim squeezed); b1: (Cout,)
    Returns (N, Cout, T).
    """
    N, C, T = x.shape
    Cout, Cin, K = wd.shape
    # The residual add in the module requires matching channel counts.
    assert K == 3 and Cin == C and Cout == C, "residual requires Cin == Cout"
    assert w1.shape == (Cout, Cout) and bd.shape == (Cout,) and b1.shape == (Cout,)
    assert 0 < dilation < T

    if batch_block is None:
        batch_block = next(b for b in (8, 4, 2, 1) if N % b == 0)
    Nb = batch_block
    assert N % Nb == 0

    # Merge the 3 taps: wd_m[o, k*Cin + c] = wd[o, c, k]  (matches in-kernel stack).
    wd_m = jnp.transpose(wd, (0, 2, 1)).reshape(Cout, 3 * Cin).astype(mxu_dtype)
    w1_m = w1.astype(mxu_dtype)
    bd2 = bd.reshape(Cout, 1).astype(jnp.float32)
    b12 = b1.reshape(Cout, 1).astype(jnp.float32)

    # Only channel 0 of the mask is used. Slicing here keeps the kernel's mask
    # DMA to a single row (reading all M channels per tile would cost more HBM
    # traffic than this tiny O(N*T) wrapper slice).
    mask0 = mask[:, 0:1, :].astype(jnp.float32)

    kernel = functools.partial(_dilated_layer_kernel, dilation=dilation)

    return pl.pallas_call(
        kernel,
        out_shape=jax.ShapeDtypeStruct((N, Cout, T), x.dtype),
        grid=(N // Nb,),
        in_specs=[
            pl.BlockSpec((Nb, C, T), lambda b: (b, 0, 0)),        # x (single read)
            pl.BlockSpec((Nb, 1, T), lambda b: (b, 0, 0)),        # mask row 0
            pl.BlockSpec((Cout, 3 * Cin), lambda b: (0, 0)),      # merged dilated W
            pl.BlockSpec((Cout, 1), lambda b: (0, 0)),            # dilated conv b
            pl.BlockSpec((Cout, Cout), lambda b: (0, 0)),         # 1x1 conv W
            pl.BlockSpec((Cout, 1), lambda b: (0, 0)),            # 1x1 conv b
        ],
        out_specs=pl.BlockSpec((Nb, Cout, T), lambda b: (b, 0, 0)),
        compiler_params=pltpu.CompilerParams(
            dimension_semantics=("parallel",)),
    )(x, mask0, wd_m, bd2, w1_m, b12)


def _reference(x, mask, wd, bd, w1, b1, *, dilation, mxu_dtype=jnp.float32):
    """Pure-JAX reference (PyTorch Conv1d semantics); mxu_dtype mirrors the
    kernel's matmul-input precision (f32 accumulation)."""
    xq = x.astype(mxu_dtype)
    wdq = wd.astype(mxu_dtype)
    dn = lax.conv_dimension_numbers(x.shape, wd.shape, ("NCH", "OIH", "NCH"))
    h = lax.conv_general_dilated(xq, wdq, window_strides=(1,),
                                 padding=[(dilation, dilation)],
                                 rhs_dilation=(dilation,),
                                 dimension_numbers=dn,
                                 preferred_element_type=jnp.float32)
    h = jax.nn.relu(h + bd[None, :, None])
    out = jnp.einsum("oc,nct->not", w1.astype(mxu_dtype), h.astype(mxu_dtype),
                     preferred_element_type=jnp.float32)
    out = out + b1[None, :, None]
    return (x + out) * mask[:, 0:1, :]


if __name__ == "__main__":
    # Small shapes consistent with the module (residual requires Cin == Cout).
    N, C, T = 4, 32, 256        # T is a multiple of 128 -> lane-dense stores
    dilation = 4

    key = jax.random.PRNGKey(0)
    kx, km, kwd, kbd, kw1, kb1 = jax.random.split(key, 6)

    x = jax.random.normal(kx, (N, C, T), jnp.float32)
    mask = (jax.random.uniform(km, (N, 3, T)) > 0.2).astype(jnp.float32)

    wd = 0.1 * jax.random.normal(kwd, (C, C, 3), jnp.float32)   # (Cout, Cin, k)
    bd = 0.1 * jax.random.normal(kbd, (C,), jnp.float32)
    w1 = 0.1 * jax.random.normal(kw1, (C, C), jnp.float32)      # (Cout, Cout)
    b1 = 0.1 * jax.random.normal(kb1, (C,), jnp.float32)

    out = dilated_layer(x, mask, wd, bd, w1, b1, dilation=dilation)
    out = jax.block_until_ready(out)
    assert out.shape == (N, C, T)

    # Tight check against a reference with matching bf16 matmul inputs.
    ref_bf16 = _reference(x, mask, wd, bd, w1, b1, dilation=dilation,
                          mxu_dtype=jnp.bfloat16)
    assert jnp.allclose(out, ref_bf16, atol=2e-3, rtol=2e-3), \
        "mismatch vs bf16-matched reference"

    # Loose check against the full-f32 reference (structural semantics).
    ref_f32 = _reference(x, mask, wd, bd, w1, b1, dilation=dilation,
                         mxu_dtype=jnp.float32)
    assert jnp.allclose(out, ref_f32, atol=5e-2, rtol=5e-2), \
        "mismatch vs f32 reference"

    print("KERNEL_OK")
</pallas_src>

<mosaic_0001>
module attributes {stable_mosaic.version = 11 : i64} {
  func.func @_dilated_layer_kernel(%arg0: i32, %arg1: memref<4x32x256xf32, #tpu.memory_space<vmem>>, %arg2: memref<4x1x256xf32, #tpu.memory_space<vmem>>, %arg3: memref<32x96xbf16, #tpu.memory_space<vmem>>, %arg4: memref<32x1xf32, #tpu.memory_space<vmem>>, %arg5: memref<32x32xbf16, #tpu.memory_space<vmem>>, %arg6: memref<32x1xf32, #tpu.memory_space<vmem>>, %arg7: memref<4x32x256xf32, #tpu.memory_space<vmem>>) attributes {dimension_semantics = [#tpu.dimension_semantics<parallel>], iteration_bounds = array<i64: 1>, scalar_prefetch = 0 : i64, scratch_operands = 0 : i64, tpu.core_type = #tpu.core_type<tc>, window_params = [{transform_indices = @transform_0, window_bounds = array<i64: 4, 32, 256>}, {transform_indices = @transform_1, window_bounds = array<i64: 4, 1, 256>}, {pipeline_mode = #tpu.pipeline_mode<synchronous>, transform_indices = @transform_2, window_bounds = array<i64: 32, 96>}, {pipeline_mode = #tpu.pipeline_mode<synchronous>, transform_indices = @transform_3, window_bounds = array<i64: 32, 1>}, {pipeline_mode = #tpu.pipeline_mode<synchronous>, transform_indices = @transform_4, window_bounds = array<i64: 32, 32>}, {pipeline_mode = #tpu.pipeline_mode<synchronous>, transform_indices = @transform_5, window_bounds = array<i64: 32, 1>}, {transform_indices = @transform_6, window_bounds = array<i64: 4, 32, 256>}]} {
    %c0 = arith.constant 0 : index
    %c0_0 = arith.constant 0 : index
    %c0_1 = arith.constant 0 : index
    %0 = vector.load %arg1[%c0, %c0_0, %c0_1] : memref<4x32x256xf32, #tpu.memory_space<vmem>>, vector<1x32x256xf32>
    %1 = vector.shape_cast %0 : vector<1x32x256xf32> to vector<32x256xf32>
    %2 = arith.truncf %1 : vector<32x256xf32> to vector<32x256xbf16>
    %cst = arith.constant 0.000000e+00 : bf16
    %3 = vector.broadcast %cst : bf16 to vector<32x4xbf16>
    %4 = vector.extract_strided_slice %2 {offsets = [0, 0], sizes = [32, 252], strides = [1, 1]} : vector<32x256xbf16> to vector<32x252xbf16>
    %5 = tpu.concatenate %3, %4 in 1 : vector<32x4xbf16>, vector<32x252xbf16> -> vector<32x256xbf16>
    %6 = vector.extract_strided_slice %2 {offsets = [0, 4], sizes = [32, 252], strides = [1, 1]} : vector<32x256xbf16> to vector<32x252xbf16>
    %7 = tpu.concatenate %6, %3 in 1 : vector<32x252xbf16>, vector<32x4xbf16> -> vector<32x256xbf16>
    %8 = tpu.concatenate %5, %2, %7 in 0 : vector<32x256xbf16>, vector<32x256xbf16>, vector<32x256xbf16> -> vector<96x256xbf16>
    %c0_2 = arith.constant 0 : index
    %c0_3 = arith.constant 0 : index
    %9 = vector.load %arg3[%c0_2, %c0_3] : memref<32x96xbf16, #tpu.memory_space<vmem>>, vector<32x96xbf16>
    %cst_4 = arith.constant dense<0.000000e+00> : vector<32x256xf32>
    %10 = tpu.matmul %9, %8, %cst_4 {dimension_numbers = #tpu.dot_dimension_numbers<[1], [0], [0], [1], [0, 0, 1, 1], [], []>} : vector<32x96xbf16>, vector<96x256xbf16>, vector<32x256xf32> -> vector<32x256xf32>
    %c0_5 = arith.constant 0 : index
    %c0_6 = arith.constant 0 : index
    %11 = vector.load %arg4[%c0_5, %c0_6] : memref<32x1xf32, #tpu.memory_space<vmem>>, vector<32x1xf32>
    %12 = vector.broadcast %11 : vector<32x1xf32> to vector<32x256xf32>
    %13 = arith.addf %10, %12 : vector<32x256xf32>
    %cst_7 = arith.constant 0.000000e+00 : f32
    %14 = vector.broadcast %cst_7 : f32 to vector<32x256xf32>
    %15 = arith.maximumf %13, %14 : vector<32x256xf32>
    %c0_8 = arith.constant 0 : index
    %c0_9 = arith.constant 0 : index
    %16 = vector.load %arg5[%c0_8, %c0_9] : memref<32x32xbf16, #tpu.memory_space<vmem>>, vector<32x32xbf16>
    %17 = arith.truncf %15 : vector<32x256xf32> to vector<32x256xbf16>
    %cst_10 = arith.constant dense<0.000000e+00> : vector<32x256xf32>
    %18 = tpu.matmul %16, %17, %cst_10 {dimension_numbers = #tpu.dot_dimension_numbers<[1], [0], [0], [1], [0, 0, 1, 1], [], []>} : vector<32x32xbf16>, vector<32x256xbf16>, vector<32x256xf32> -> vector<32x256xf32>
    %c0_11 = arith.constant 0 : index
    %c0_12 = arith.constant 0 : index
    %19 = vector.load %arg6[%c0_11, %c0_12] : memref<32x1xf32, #tpu.memory_space<vmem>>, vector<32x1xf32>
    %20 = vector.broadcast %19 : vector<32x1xf32> to vector<32x256xf32>
    %21 = arith.addf %18, %20 : vector<32x256xf32>
    %22 = arith.addf %1, %21 : vector<32x256xf32>
    %c0_13 = arith.constant 0 : index
    %c0_14 = arith.constant 0 : index
    %c0_15 = arith.constant 0 : index
    %23 = vector.load %arg2[%c0_13, %c0_14, %c0_15] : memref<4x1x256xf32, #tpu.memory_space<vmem>>, vector<1x1x256xf32>
    %24 = vector.shape_cast %23 : vector<1x1x256xf32> to vector<1x256xf32>
    %25 = vector.broadcast %24 : vector<1x256xf32> to vector<32x256xf32>
    %26 = arith.mulf %22, %25 : vector<32x256xf32>
    %c0_16 = arith.constant 0 : index
    %c0_17 = arith.constant 0 : index
    %c0_18 = arith.constant 0 : index
    %27 = vector.load %arg7[%c0_16, %c0_17, %c0_18] : memref<4x32x256xf32, #tpu.memory_space<vmem>>, vector<1x32x256xf32>
    %28 = vector.shape_cast %27 : vector<1x32x256xf32> to vector<32x256xf32>
    %29 = vector.shape_cast %26 : vector<32x256xf32> to vector<1x32x256xf32>
    tpu.vector_store %arg7[%c0_16, %c0_17, %c0_18], %29 {strides = array<i32>} : memref<4x32x256xf32, #tpu.memory_space<vmem>>, vector<1x32x256xf32>,
    %c1 = arith.constant 1 : index
    %c0_19 = arith.constant 0 : index
    %c0_20 = arith.constant 0 : index
    %30 = vector.load %arg1[%c1, %c0_19, %c0_20] : memref<4x32x256xf32, #tpu.memory_space<vmem>>, vector<1x32x256xf32>
    %31 = vector.shape_cast %30 : vector<1x32x256xf32> to vector<32x256xf32>
    %32 = arith.truncf %31 : vector<32x256xf32> to vector<32x256xbf16>
    %cst_21 = arith.constant 0.000000e+00 : bf16
    %33 = vector.broadcast %cst_21 : bf16 to vector<32x4xbf16>
    %34 = vector.extract_strided_slice %32 {offsets = [0, 0], sizes = [32, 252], strides = [1, 1]} : vector<32x256xbf16> to vector<32x252xbf16>
    %35 = tpu.concatenate %33, %34 in 1 : vector<32x4xbf16>, vector<32x252xbf16> -> vector<32x256xbf16>
    %36 = vector.extract_strided_slice %32 {offsets = [0, 4], sizes = [32, 252], strides = [1, 1]} : vector<32x256xbf16> to vector<32x252xbf16>
    %37 = tpu.concatenate %36, %33 in 1 : vector<32x252xbf16>, vector<32x4xbf16> -> vector<32x256xbf16>
    %38 = tpu.concatenate %35, %32, %37 in 0 : vector<32x256xbf16>, vector<32x256xbf16>, vector<32x256xbf16> -> vector<96x256xbf16>
    %c0_22 = arith.constant 0 : index
    %c0_23 = arith.constant 0 : index
    %39 = vector.load %arg3[%c0_22, %c0_23] : memref<32x96xbf16, #tpu.memory_space<vmem>>, vector<32x96xbf16>
    %cst_24 = arith.constant dense<0.000000e+00> : vector<32x256xf32>
    %40 = tpu.matmul %39, %38, %cst_24 {dimension_numbers = #tpu.dot_dimension_numbers<[1], [0], [0], [1], [0, 0, 1, 1], [], []>} : vector<32x96xbf16>, vector<96x256xbf16>, vector<32x256xf32> -> vector<32x256xf32>
    %c0_25 = arith.constant 0 : index
    %c0_26 = arith.constant 0 : index
    %41 = vector.load %arg4[%c0_25, %c0_26] : memref<32x1xf32, #tpu.memory_space<vmem>>, vector<32x1xf32>
    %42 = vector.broadcast %41 : vector<32x1xf32> to vector<32x256xf32>
    %43 = arith.addf %40, %42 : vector<32x256xf32>
    %cst_27 = arith.constant 0.000000e+00 : f32
    %44 = vector.broadcast %cst_27 : f32 to vector<32x256xf32>
    %45 = arith.maximumf %43, %44 : vector<32x256xf32>
    %c0_28 = arith.constant 0 : index
    %c0_29 = arith.constant 0 : index
    %46 = vector.load %arg5[%c0_28, %c0_29] : memref<32x32xbf16, #tpu.memory_space<vmem>>, vector<32x32xbf16>
    %47 = arith.truncf %45 : vector<32x256xf32> to vector<32x256xbf16>
    %cst_30 = arith.constant dense<0.000000e+00> : vector<32x256xf32>
    %48 = tpu.matmul %46, %47, %cst_30 {dimension_numbers = #tpu.dot_dimension_numbers<[1], [0], [0], [1], [0, 0, 1, 1], [], []>} : vector<32x32xbf16>, vector<32x256xbf16>, vector<32x256xf32> -> vector<32x256xf32>
    %c0_31 = arith.constant 0 : index
    %c0_32 = arith.constant 0 : index
    %49 = vector.load %arg6[%c0_31, %c0_32] : memref<32x1xf32, #tpu.memory_space<vmem>>, vector<32x1xf32>
    %50 = vector.broadcast %49 : vector<32x1xf32> to vector<32x256xf32>
    %51 = arith.addf %48, %50 : vector<32x256xf32>
    %52 = arith.addf %31, %51 : vector<32x256xf32>
    %c1_33 = arith.constant 1 : index
    %c0_34 = arith.constant 0 : index
    %c0_35 = arith.constant 0 : index
    %53 = vector.load %arg2[%c1_33, %c0_34, %c0_35] : memref<4x1x256xf32, #tpu.memory_space<vmem>>, vector<1x1x256xf32>
    %54 = vector.shape_cast %53 : vector<1x1x256xf32> to vector<1x256xf32>
    %55 = vector.broadcast %54 : vector<1x256xf32> to vector<32x256xf32>
    %56 = arith.mulf %52, %55 : vector<32x256xf32>
    %c1_36 = arith.constant 1 : index
    %c0_37 = arith.constant 0 : index
    %c0_38 = arith.constant 0 : index
    %57 = vector.load %arg7[%c1_36, %c0_37, %c0_38] : memref<4x32x256xf32, #tpu.memory_space<vmem>>, vector<1x32x256xf32>
    %58 = vector.shape_cast %57 : vector<1x32x256xf32> to vector<32x256xf32>
    %59 = vector.shape_cast %56 : vector<32x256xf32> to vector<1x32x256xf32>
    tpu.vector_store %arg7[%c1_36, %c0_37, %c0_38], %59 {strides = array<i32>} : memref<4x32x256xf32, #tpu.memory_space<vmem>>, vector<1x32x256xf32>,
    %c2 = arith.constant 2 : index
    %c0_39 = arith.constant 0 : index
    %c0_40 = arith.constant 0 : index
    %60 = vector.load %arg1[%c2, %c0_39, %c0_40] : memref<4x32x256xf32, #tpu.memory_space<vmem>>, vector<1x32x256xf32>
    %61 = vector.shape_cast %60 : vector<1x32x256xf32> to vector<32x256xf32>
    %62 = arith.truncf %61 : vector<32x256xf32> to vector<32x256xbf16>
    %cst_41 = arith.constant 0.000000e+00 : bf16
    %63 = vector.broadcast %cst_41 : bf16 to vector<32x4xbf16>
    %64 = vector.extract_strided_slice %62 {offsets = [0, 0], sizes = [32, 252], strides = [1, 1]} : vector<32x256xbf16> to vector<32x252xbf16>
    %65 = tpu.concatenate %63, %64 in 1 : vector<32x4xbf16>, vector<32x252xbf16> -> vector<32x256xbf16>
    %66 = vector.extract_strided_slice %62 {offsets = [0, 4], sizes = [32, 252], strides = [1, 1]} : vector<32x256xbf16> to vector<32x252xbf16>
    %67 = tpu.concatenate %66, %63 in 1 : vector<32x252xbf16>, vector<32x4xbf16> -> vector<32x256xbf16>
    %68 = tpu.concatenate %65, %62, %67 in 0 : vector<32x256xbf16>, vector<32x256xbf16>, vector<32x256xbf16> -> vector<96x256xbf16>
    %c0_42 = arith.constant 0 : index
    %c0_43 = arith.constant 0 : index
    %69 = vector.load %arg3[%c0_42, %c0_43] : memref<32x96xbf16, #tpu.memory_space<vmem>>, vector<32x96xbf16>
    %cst_44 = arith.constant dense<0.000000e+00> : vector<32x256xf32>
    %70 = tpu.matmul %69, %68, %cst_44 {dimension_numbers = #tpu.dot_dimension_numbers<[1], [0], [0], [1], [0, 0, 1, 1], [], []>} : vector<32x96xbf16>, vector<96x256xbf16>, vector<32x256xf32> -> vector<32x256xf32>
    %c0_45 = arith.constant 0 : index
    %c0_46 = arith.constant 0 : index
    %71 = vector.load %arg4[%c0_45, %c0_46] : memref<32x1xf32, #tpu.memory_space<vmem>>, vector<32x1xf32>
    %72 = vector.broadcast %71 : vector<32x1xf32> to vector<32x256xf32>
    %73 = arith.addf %70, %72 : vector<32x256xf32>
    %cst_47 = arith.constant 0.000000e+00 : f32
    %74 = vector.broadcast %cst_47 : f32 to vector<32x256xf32>
    %75 = arith.maximumf %73, %74 : vector<32x256xf32>
    %c0_48 = arith.constant 0 : index
    %c0_49 = arith.constant 0 : index
    %76 = vector.load %arg5[%c0_48, %c0_49] : memref<32x32xbf16, #tpu.memory_space<vmem>>, vector<32x32xbf16>
    %77 = arith.truncf %75 : vector<32x256xf32> to vector<32x256xbf16>
    %cst_50 = arith.constant dense<0.000000e+00> : vector<32x256xf32>
    %78 = tpu.matmul %76, %77, %cst_50 {dimension_numbers = #tpu.dot_dimension_numbers<[1], [0], [0], [1], [0, 0, 1, 1], [], []>} : vector<32x32xbf16>, vector<32x256xbf16>, vector<32x256xf32> -> vector<32x256xf32>
    %c0_51 = arith.constant 0 : index
    %c0_52 = arith.constant 0 : index
    %79 = vector.load %arg6[%c0_51, %c0_52] : memref<32x1xf32, #tpu.memory_space<vmem>>, vector<32x1xf32>
    %80 = vector.broadcast %79 : vector<32x1xf32> to vector<32x256xf32>
    %81 = arith.addf %78, %80 : vector<32x256xf32>
    %82 = arith.addf %61, %81 : vector<32x256xf32>
    %c2_53 = arith.constant 2 : index
    %c0_54 = arith.constant 0 : index
    %c0_55 = arith.constant 0 : index
    %83 = vector.load %arg2[%c2_53, %c0_54, %c0_55] : memref<4x1x256xf32, #tpu.memory_space<vmem>>, vector<1x1x256xf32>
    %84 = vector.shape_cast %83 : vector<1x1x256xf32> to vector<1x256xf32>
    %85 = vector.broadcast %84 : vector<1x256xf32> to vector<32x256xf32>
    %86 = arith.mulf %82, %85 : vector<32x256xf32>
    %c2_56 = arith.constant 2 : index
    %c0_57 = arith.constant 0 : index
    %c0_58 = arith.constant 0 : index
    %87 = vector.load %arg7[%c2_56, %c0_57, %c0_58] : memref<4x32x256xf32, #tpu.memory_space<vmem>>, vector<1x32x256xf32>
    %88 = vector.shape_cast %87 : vector<1x32x256xf32> to vector<32x256xf32>
    %89 = vector.shape_cast %86 : vector<32x256xf32> to vector<1x32x256xf32>
    tpu.vector_store %arg7[%c2_56, %c0_57, %c0_58], %89 {strides = array<i32>} : memref<4x32x256xf32, #tpu.memory_space<vmem>>, vector<1x32x256xf32>,
    %c3 = arith.constant 3 : index
    %c0_59 = arith.constant 0 : index
    %c0_60 = arith.constant 0 : index
    %90 = vector.load %arg1[%c3, %c0_59, %c0_60] : memref<4x32x256xf32, #tpu.memory_space<vmem>>, vector<1x32x256xf32>
    %91 = vector.shape_cast %90 : vector<1x32x256xf32> to vector<32x256xf32>
    %92 = arith.truncf %91 : vector<32x256xf32> to vector<32x256xbf16>
    %cst_61 = arith.constant 0.000000e+00 : bf16
    %93 = vector.broadcast %cst_61 : bf16 to vector<32x4xbf16>
    %94 = vector.extract_strided_slice %92 {offsets = [0, 0], sizes = [32, 252], strides = [1, 1]} : vector<32x256xbf16> to vector<32x252xbf16>
    %95 = tpu.concatenate %93, %94 in 1 : vector<32x4xbf16>, vector<32x252xbf16> -> vector<32x256xbf16>
    %96 = vector.extract_strided_slice %92 {offsets = [0, 4], sizes = [32, 252], strides = [1, 1]} : vector<32x256xbf16> to vector<32x252xbf16>
    %97 = tpu.concatenate %96, %93 in 1 : vector<32x252xbf16>, vector<32x4xbf16> -> vector<32x256xbf16>
    %98 = tpu.concatenate %95, %92, %97 in 0 : vector<32x256xbf16>, vector<32x256xbf16>, vector<32x256xbf16> -> vector<96x256xbf16>
    %c0_62 = arith.constant 0 : index
    %c0_63 = arith.constant 0 : index
    %99 = vector.load %arg3[%c0_62, %c0_63] : memref<32x96xbf16, #tpu.memory_space<vmem>>, vector<32x96xbf16>
    %cst_64 = arith.constant dense<0.000000e+00> : vector<32x256xf32>
    %100 = tpu.matmul %99, %98, %cst_64 {dimension_numbers = #tpu.dot_dimension_numbers<[1], [0], [0], [1], [0, 0, 1, 1], [], []>} : vector<32x96xbf16>, vector<96x256xbf16>, vector<32x256xf32> -> vector<32x256xf32>
    %c0_65 = arith.constant 0 : index
    %c0_66 = arith.constant 0 : index
    %101 = vector.load %arg4[%c0_65, %c0_66] : memref<32x1xf32, #tpu.memory_space<vmem>>, vector<32x1xf32>
    %102 = vector.broadcast %101 : vector<32x1xf32> to vector<32x256xf32>
    %103 = arith.addf %100, %102 : vector<32x256xf32>
    %cst_67 = arith.constant 0.000000e+00 : f32
    %104 = vector.broadcast %cst_67 : f32 to vector<32x256xf32>
    %105 = arith.maximumf %103, %104 : vector<32x256xf32>
    %c0_68 = arith.constant 0 : index
    %c0_69 = arith.constant 0 : index
    %106 = vector.load %arg5[%c0_68, %c0_69] : memref<32x32xbf16, #tpu.memory_space<vmem>>, vector<32x32xbf16>
    %107 = arith.truncf %105 : vector<32x256xf32> to vector<32x256xbf16>
    %cst_70 = arith.constant dense<0.000000e+00> : vector<32x256xf32>
    %108 = tpu.matmul %106, %107, %cst_70 {dimension_numbers = #tpu.dot_dimension_numbers<[1], [0], [0], [1], [0, 0, 1, 1], [], []>} : vector<32x32xbf16>, vector<32x256xbf16>, vector<32x256xf32> -> vector<32x256xf32>
    %c0_71 = arith.constant 0 : index
    %c0_72 = arith.constant 0 : index
    %109 = vector.load %arg6[%c0_71, %c0_72] : memref<32x1xf32, #tpu.memory_space<vmem>>, vector<32x1xf32>
    %110 = vector.broadcast %109 : vector<32x1xf32> to vector<32x256xf32>
    %111 = arith.addf %108, %110 : vector<32x256xf32>
    %112 = arith.addf %91, %111 : vector<32x256xf32>
    %c3_73 = arith.constant 3 : index
    %c0_74 = arith.constant 0 : index
    %c0_75 = arith.constant 0 : index
    %113 = vector.load %arg2[%c3_73, %c0_74, %c0_75] : memref<4x1x256xf32, #tpu.memory_space<vmem>>, vector<1x1x256xf32>
    %114 = vector.shape_cast %113 : vector<1x1x256xf32> to vector<1x256xf32>
    %115 = vector.broadcast %114 : vector<1x256xf32> to vector<32x256xf32>
    %116 = arith.mulf %112, %115 : vector<32x256xf32>
    %c3_76 = arith.constant 3 : index
    %c0_77 = arith.constant 0 : index
    %c0_78 = arith.constant 0 : index
    %117 = vector.load %arg7[%c3_76, %c0_77, %c0_78] : memref<4x32x256xf32, #tpu.memory_space<vmem>>, vector<1x32x256xf32>
    %118 = vector.shape_cast %117 : vector<1x32x256xf32> to vector<32x256xf32>
    %119 = vector.shape_cast %116 : vector<32x256xf32> to vector<1x32x256xf32>
    tpu.vector_store %arg7[%c3_76, %c0_77, %c0_78], %119 {strides = array<i32>} : memref<4x32x256xf32, #tpu.memory_space<vmem>>, vector<1x32x256xf32>,
    return
  }
  func.func @transform_0(%arg0: i32) -> (i32, i32, i32) {
    %c0_i32 = arith.constant 0 : i32
    %c0_i32_0 = arith.constant 0 : i32
    %c0_i32_1 = arith.constant 0 : i32
    return %arg0, %c0_i32, %c0_i32_0 : i32, i32, i32
  }
  func.func @transform_1(%arg0: i32) -> (i32, i32, i32) {
    %c0_i32 = arith.constant 0 : i32
    %c0_i32_0 = arith.constant 0 : i32
    %c0_i32_1 = arith.constant 0 : i32
    return %arg0, %c0_i32, %c0_i32_0 : i32, i32, i32
  }
  func.func @transform_2(%arg0: i32) -> (i32, i32) {
    %c0_i32 = arith.constant 0 : i32
    %c0_i32_0 = arith.constant 0 : i32
    %c0_i32_1 = arith.constant 0 : i32
    return %c0_i32, %c0_i32_0 : i32, i32
  }
  func.func @transform_3(%arg0: i32) -> (i32, i32) {
    %c0_i32 = arith.constant 0 : i32
    %c0_i32_0 = arith.constant 0 : i32
    %c0_i32_1 = arith.constant 0 : i32
    return %c0_i32, %c0_i32_0 : i32, i32
  }
  func.func @transform_4(%arg0: i32) -> (i32, i32) {
    %c0_i32 = arith.constant 0 : i32
    %c0_i32_0 = arith.constant 0 : i32
    %c0_i32_1 = arith.constant 0 : i32
    return %c0_i32, %c0_i32_0 : i32, i32
  }
  func.func @transform_5(%arg0: i32) -> (i32, i32) {
    %c0_i32 = arith.constant 0 : i32
    %c0_i32_0 = arith.constant 0 : i32
    %c0_i32_1 = arith.constant 0 : i32
    return %c0_i32, %c0_i32_0 : i32, i32
  }
  func.func @transform_6(%arg0: i32) -> (i32, i32, i32) {
    %c0_i32 = arith.constant 0 : i32
    %c0_i32_0 = arith.constant 0 : i32
    %c0_i32_1 = arith.constant 0 : i32
    return %arg0, %c0_i32, %c0_i32_0 : i32, i32, i32
  }
}

</mosaic_0001>

<bundles_post_ra>
// kernel: tpu_custom_call.1
= control target key start
LH: loop header
LB: loop body
LE: loop exit
PB: predicated region body
PF: predicated region fallthrough
CT: control target
= control target key end

     0   :  { %11 = vsyncpa [#allocation3], 0  ;;  %s1961_s0 = inlined_call_operand.hbm [shape: f32[4,32,256], index: 0, kind: input, shape index: {}]   ;;  %s1962_s1 = inlined_call_operand.vmem [shape: f32[4,1,256], index: 1, kind: input, shape index: {}]   ;;  %s1963_s2 = inlined_call_operand.vmem [shape: bf16[32,96], index: 2, kind: input, shape index: {}]   ;;  %s1964_s3 = inlined_call_operand.vmem [shape: f32[32,1], index: 3, kind: input, shape index: {}]   ;;  %s1965_s4 = inlined_call_operand.vmem [shape: bf16[32,32], index: 4, kind: input, shape index: {}]   ;;  %s1966_s5 = inlined_call_operand.vmem [shape: f32[32,1], index: 5, kind: input, shape index: {}]   ;;  %s1967_s6 = inlined_call_operand.hbm [shape: f32[4,32,256], index: 6, kind: output, shape index: {}]  }
   0x1   :  { %12 = vsyncpa [#allocation4], 0  ;;  %s1382_s21 = smov [#allocation2]   ;;  %s1334_s25 = scalar_lea.hbm %s1961_s0, 4096 }
   0x2   :  { %s18_s22 = sshll.u32 %s1382_s21, 4  ;;  %p1335_p0 = scmp.ne.s32.totalorder %s1961_s0, %s1334_s25  ;;  %s19_s22 = int_to_ptr.vmem [resolvable:$true] %s18_s22 }
   0x3   :  { %p1338_p1 = scmp.lt.u32.totalorder %s1334_s25, %s1961_s0 }
   0x5   :  { %p1340_p2 = pnand %p1338_p1, %p1335_p0 }
   0x7   :  { %1343 = shalt.err (!%p1340_p2)
}
   0x8   :  { %s1344_s30 = scalar_lea.vmem %s19_s22, 4096  ;;  %p1349_p4 = scmp.lt.s32.totalorder %s19_s22, %s19_s22 }
   0x9   :  { %p1345_p3 = scmp.ne.s32.totalorder %s19_s22, %s1344_s30  ;;  %p1350_p5 = scmp.lt.s32.totalorder %s1344_s30, %s1344_s30 }
   0xb   :  { %p1351_p6 = por %p1350_p5, %p1349_p4 }
   0xd   :  { %p1352_p7 = pnand %p1351_p6, %p1345_p3 }
   0xf   :  { %1355 = shalt.err (!%p1352_p7)
}
  0x10   :  { %s1383_s7 = smov 256   ;;  %s1384_s8 = smov 16  }
  0x11   :  { %24 = dma.hbm_to_vmem [thread:$0]  %s1961_s0, 4096, %s19_s22, [#allocation3], %s1383_s7, %s1383_s7, %s1384_s8  }
  0x12   :  { %1378 = dma.done.wait [#allocation3], 4096  }
  0x13   :  { %1379 = vsyncadd [#allocation3], 4294963200  ;;  %v1439_v0 = vld [vmem:[#allocation2 + $0x20] sm:$0xff]  ;;  %v1441_v1 = vld [vmem:[#allocation2 + $0x30] sm:$0xff]  ;;  %v1968_v10 = vmov 0   ;;  %s1386_s0 = smov 4  }
  0x14   :  { %v1443_v2 = vld [vmem:[#allocation2] sm:$0xff]  ;;  %v1447_v3 = vpack.c.bf16 %v1441_v1, %v1439_v0  ;;  %v1449_v4 = vld [vmem:[#allocation2 + $0x10] sm:$0xff]  ;;  %v1451_v5 = vld [vmem:[#allocation2 + $0x28] sm:$0xff]  ;;  %1315 = vset.pattern.permute.xlu1 %v1968_v10  ;;  %1314 = vset.pattern.permute.xlu0 %v1968_v10  ;;  %s1387_s11 = smov 124   ;;  %vm63_vm0 = vcmask 31744   ;;  %vm84_vm2 = vcmask 1014784  }
  0x15   :  { %v1453_v6 = vld [vmem:[#allocation2 + $0x38] sm:$0xff]  ;;  %v1457_v7 = vpack.c.bf16 %v1449_v4, %v1443_v2  ;;  %v1459_v8 = vld [vmem:[#allocation2 + $0x8] sm:$0xff]  ;;  %173 = vmatprep.mubr.bf16.mxu0 %v1968_v10  ;;  %283 = vmatprep.mubr.bf16.mxu1 %v1968_v10  ;;  %v1499_v14 = vld [vmem:[%s1964_s3] sm:$0xff]  ;;  %vm134_vm3 = vcmask 785408   ;;  %vm244_vm4 = vcmask 261120  }
  0x16   :  { %v1461_v9 = vld [vmem:[#allocation2 + $0x18] sm:$0xff]  ;;  %59 = vrot.lane.b32.xlu1 %v1447_v3, %s1386_s0  ;;  %v1469_v11 = vpack.c.bf16 %v1453_v6, %v1451_v5  ;;  %v1490_v13 = vld [vmem:[%s1964_s3 + $0x8] sm:$0xff]  ;;  %v1506_v15 = vld [vmem:[%s1964_s3 + $0x10] sm:$0xff] }
  0x17   :  { %55 = vrot.lane.b32.xlu0 %v1457_v7, %s1386_s0  ;;  %v1476_v12 = vpack.c.bf16 %v1461_v9, %v1459_v8  ;;  %v1508_v16 = vld [vmem:[#allocation2 + $0x40] sm:$0xff]  ;;  %v1510_v17 = vld [vmem:[#allocation2 + $0x50] sm:$0xff]  ;;  %v1515_v18 = vld [vmem:[%s1964_s3 + $0x18] sm:$0xff] }
  0x18   :  { %v1517_v19 = vld [vmem:[#allocation2 + $0x48] sm:$0xff]  ;;  %v1519_v20 = vld [vmem:[#allocation2 + $0x58] sm:$0xff]  ;;  %v1524_v21 = vpack.c.bf16 %v1510_v17, %v1508_v16  ;;  %v1531_v23 = vld [vmem:[#allocation2 + $0x60] sm:$0xff] }
  0x19   :  { %v1529_v22 = vpack.c.bf16 %v1519_v20, %v1517_v19  ;;  %v1533_v24 = vld [vmem:[#allocation2 + $0x70] sm:$0xff]  ;;  %v1535_v25 = vld [vmem:[#allocation2 + $0x68] sm:$0xff]  ;;  %v1537_v26 = vld [vmem:[#allocation2 + $0x78] sm:$0xff] }
  0x1a   :  { %61 = vrot.lane.b32.xlu1 %v1469_v11, %s1386_s0  ;;  %v1543_v27 = vpack.c.bf16 %v1533_v24, %v1531_v23  ;;  %v1549_v28 = vpack.c.bf16 %v1537_v26, %v1535_v25  ;;  %v1559_v29 = vld [vmem:[#allocation2 + $0x80] sm:$0xff]  ;;  %v1561_v30 = vld [vmem:[#allocation2 + $0x90] sm:$0xff]  ;;  %v1563_v31 = vld [vmem:[#allocation2 + $0x88] sm:$0xff] }
  0x1b   :  { %57 = vrot.lane.b32.xlu0 %v1476_v12, %s1386_s0  ;;  %v1565_v32 = vld [vmem:[#allocation2 + $0x98] sm:$0xff]  ;;  %v1571_v33 = vpack.c.bf16 %v1561_v30, %v1559_v29  ;;  %v1579_v35 = vld [vmem:[#allocation2 + $0xa0] sm:$0xff]  ;;  %v1581_v36 = vld [vmem:[#allocation2 + $0xb0] sm:$0xff] }
  0x1c   :  { %v1577_v34 = vpack.c.bf16 %v1565_v32, %v1563_v31  ;;  %1984 = vst [vmem:[#allocation8_spill] sm:$0xff] %v1579_v35  ;;  %1985 = vst [vmem:[#allocation9_spill] sm:$0xff] %v1581_v36  ;;  %v1583_v37 = vld [vmem:[#allocation2 + $0xa8] sm:$0xff]  ;;  %v1585_v38 = vld [vmem:[#allocation2 + $0xb8] sm:$0xff]  ;;  %v1591_v39 = vpack.c.bf16 %v1581_v36, %v1579_v35 }
  0x1d   :  { %1986 = vst [vmem:[#allocation10_spill] sm:$0xff] %v1583_v37  ;;  %1987 = vst [vmem:[#allocation11_spill] sm:$0xff] %v1585_v38  ;;  %v1597_v40 = vpack.c.bf16 %v1585_v38, %v1583_v37  ;;  %v1617_v41 = vld [vmem:[#allocation2 + $0xc0] sm:$0xff]  ;;  %v1619_v42 = vld [vmem:[#allocation2 + $0xd0] sm:$0xff] }
  0x1e   :  { %78 = vrot.lane.b32.xlu1 %v1476_v12, %s1387_s11  ;;  %1988 = vst [vmem:[#allocation12_spill] sm:$0xff] %v1617_v41  ;;  %1989 = vst [vmem:[#allocation13_spill] sm:$0xff] %v1619_v42  ;;  %v1621_v43 = vld [vmem:[#allocation2 + $0xc8] sm:$0xff]  ;;  %v1623_v44 = vld [vmem:[#allocation2 + $0xd8] sm:$0xff]  ;;  %v1628_v45 = vpack.c.bf16 %v1619_v42, %v1617_v41 }
  0x1f   :  { %76 = vrot.lane.b32.xlu0 %v1457_v7, %s1387_s11  ;;  %1990 = vst [vmem:[#allocation14_spill] sm:$0xff] %v1621_v43  ;;  %1991 = vst [vmem:[#allocation15_spill] sm:$0xff] %v1623_v44  ;;  %v1633_v46 = vpack.c.bf16 %v1623_v44, %v1621_v43  ;;  %v1635_v47 = vld [vmem:[#allocation2 + $0xe0] sm:$0xff]  ;;  %v941_v48 = vld [vmem:[#allocation2 + $0xf0] sm:$0xff] }
  0x20   :  { %1992 = vst [vmem:[#allocation16_spill] sm:$0xff] %v1635_v47  ;;  %v1637_v49 = vld [vmem:[#allocation2 + $0xe8] sm:$0xff]  ;;  %v942_v50 = vld [vmem:[#allocation2 + $0xf8] sm:$0xff]  ;;  %v1642_v51 = vpack.c.bf16 %v941_v48, %v1635_v47  ;;  %v210_v53 = vld [vmem:[%s1966_s5] sm:$0xff] }
  0x21   :  { %1993 = vst [vmem:[#allocation17_spill] sm:$0xff] %v1637_v49  ;;  %v1647_v52 = vpack.c.bf16 %v942_v50, %v1637_v49  ;;  %v211_v54 = vld [vmem:[%s1966_s5 + $0x8] sm:$0xff]  ;;  %v212_v55 = vld [vmem:[%s1966_s5 + $0x10] sm:$0xff]  ;;  %v213_v56 = vld [vmem:[%s1966_s5 + $0x18] sm:$0xff] }
  0x22   :  { %82 = vrot.lane.b32.xlu1 %v1469_v11, %s1387_s11  ;;  %vm1678_vm1 = vmneg %vm63_vm0 }
  0x23   :  { %80 = vrot.lane.b32.xlu0 %v1447_v3, %s1387_s11 }
  0x26   :  { %111 = vperm.xlu1 %1315, %v1490_v13  }
  0x27   :  { %106 = vperm.xlu0 %1314, %v1499_v14  }
  0x2a   :  { %116 = vperm.xlu1 %1315, %v1506_v15  }
  0x2b   :  { %121 = vperm.xlu0 %1314, %v1515_v18  }
  0x2e   :  { %357 = vrot.lane.b32.xlu1 %v1524_v21, %s1386_s0 }
  0x2f   :  { %359 = vrot.lane.b32.xlu0 %v1529_v22, %s1386_s0 }
  0x32   :  { %361 = vrot.lane.b32.xlu1 %v1543_v27, %s1386_s0 }
  0x33   :  { %363 = vrot.lane.b32.xlu0 %v1549_v28, %s1386_s0 }
  0x36   :  { %375 = vrot.lane.b32.xlu1 %v1524_v21, %s1387_s11 }
  0x37   :  { %377 = vrot.lane.b32.xlu0 %v1529_v22, %s1387_s11 }
  0x3a   :  { %379 = vrot.lane.b32.xlu1 %v1543_v27, %s1387_s11 }
  0x3b   :  { %381 = vrot.lane.b32.xlu0 %v1549_v28, %s1387_s11 }
  0x3e   :  { %654 = vrot.lane.b32.xlu1 %v1571_v33, %s1386_s0 }
  0x3f   :  { %656 = vrot.lane.b32.xlu0 %v1577_v34, %s1386_s0 }
  0x42   :  { %658 = vrot.lane.b32.xlu1 %v1591_v39, %s1386_s0 }
  0x43   :  { %660 = vrot.lane.b32.xlu0 %v1597_v40, %s1386_s0 }
  0x46   :  { %672 = vrot.lane.b32.xlu1 %v1571_v33, %s1387_s11 }
  0x47   :  { %674 = vrot.lane.b32.xlu0 %v1577_v34, %s1387_s11 }
  0x4a   :  { %676 = vrot.lane.b32.xlu1 %v1591_v39, %s1387_s11 }
  0x4b   :  { %678 = vrot.lane.b32.xlu0 %v1597_v40, %s1387_s11 }
  0x4e   :  { %403 = vperm.xlu1 %1315, %v1499_v14  }
  0x4f   :  { %408 = vperm.xlu0 %1314, %v1490_v13  }
  0x52   :  { %413 = vperm.xlu1 %1315, %v1506_v15  }
  0x53   :  { %418 = vperm.xlu0 %1314, %v1515_v18  }
  0x56   :  { %700 = vperm.xlu1 %1315, %v1499_v14  }
  0x57   :  { %705 = vperm.xlu0 %1314, %v1490_v13  }
  0x5a   :  { %710 = vperm.xlu1 %1315, %v1506_v15  }
  0x5b   :  { %715 = vperm.xlu0 %1314, %v1515_v18  }
  0x5e   :  { %951 = vrot.lane.b32.xlu1 %v1628_v45, %s1386_s0 }
  0x5f   :  { %953 = vrot.lane.b32.xlu0 %v1633_v46, %s1386_s0 }
  0x62   :  { %955 = vrot.lane.b32.xlu1 %v1642_v51, %s1386_s0 }
  0x63   :  { %957 = vrot.lane.b32.xlu0 %v1647_v52, %s1386_s0 }
  0x66   :  { %969 = vrot.lane.b32.xlu1 %v1628_v45, %s1387_s11 }
  0x67   :  { %971 = vrot.lane.b32.xlu0 %v1633_v46, %s1387_s11 }
  0x6a   :  { %973 = vrot.lane.b32.xlu1 %v1642_v51, %s1387_s11 }
  0x6b   :  { %975 = vrot.lane.b32.xlu0 %v1647_v52, %s1387_s11 }
  0x6e   :  { %997 = vperm.xlu1 %1315, %v1499_v14  }
  0x6f   :  { %1002 = vperm.xlu0 %1314, %v1490_v13  }
  0x72   :  { %1007 = vperm.xlu1 %1315, %v1506_v15  }
  0x73   :  { %1012 = vperm.xlu0 %1314, %v1515_v18  }
  0x76   :  { %216 = vperm.xlu1 %1315, %v210_v53  }
  0x77   :  { %221 = vperm.xlu0 %1314, %v211_v54  }
  0x7a   :  { %226 = vperm.xlu1 %1315, %v212_v55  }
  0x7b   :  { %231 = vperm.xlu0 %1314, %v213_v56  }
  0x7e   :  { %512 = vperm.xlu1 %1315, %v210_v53  }
  0x7f   :  { %517 = vperm.xlu0 %1314, %v211_v54  }
  0x82   :  { %522 = vperm.xlu1 %1315, %v212_v55  }
  0x83   :  { %527 = vperm.xlu0 %1314, %v213_v56  }
  0x86   :  { %809 = vperm.xlu1 %1315, %v210_v53  }
  0x87   :  { %814 = vperm.xlu0 %1314, %v211_v54  }
  0x88   :  { %v60_v57 = vpop.permute.xlu1 %59 }
  0x89   :  { %v56_v58 = vpop.permute.xlu0 %55 }
  0x8a   :  { %819 = vperm.xlu1 %1315, %v212_v55  }
  0x8b   :  { %824 = vperm.xlu0 %1314, %v213_v56  }
  0x8c   :  { %v62_v59 = vpop.permute.xlu1 %61 }
  0x8d   :  { %v58_v60 = vpop.permute.xlu0 %57  ;;  %v65_v63 = vsel %vm63_vm0, %v60_v57, %v62_v59 }
  0x8e   :  { %v64_v62 = vsel %vm63_vm0, %v56_v58, %v58_v60  ;;  %1106 = vperm.xlu1 %1315, %v210_v53  }
  0x8f   :  { %141 = vmatprep.subr.bf16.mxu0 %v64_v62  ;;  %1111 = vperm.xlu0 %1314, %v211_v54  }
  0x90   :  { %1251 = vmatpush1.bf16.msk.msra.mxu0 %vm1678_vm1, %v56_v58  ;;  %v79_v13 = vpop.permute.xlu1 %78 }
  0x91   :  { %143 = vmatprep.subr.bf16.mxu0 %v65_v63  ;;  %v77_v14 = vpop.permute.xlu0 %76 }
  0x92   :  { %1116 = vperm.xlu1 %1315, %v212_v55   ;;  %v85_v15 = vsel %vm84_vm2, %v77_v14, %v79_v13 }
  0x93   :  { %1121 = vperm.xlu0 %1314, %v213_v56  }
  0x94   :  { %1253 = vmatpush1.bf16.msk.msra.mxu0 %vm1678_vm1, %v60_v57  ;;  %v83_v18 = vpop.permute.xlu1 %82 }
  0x95   :  { %145 = vmatprep.subr.bf16.mxu0 %v1476_v12  ;;  %v81_v48 = vpop.permute.xlu0 %80 }
  0x96   :  { %v86_v12 = vsel %vm84_vm2, %v81_v48, %v83_v18 }
  0x98   :  { %146 = vmatpush1.bf16.msra.mxu0 %v1457_v7  ;;  %v1316_v7 = vld [vmem:[%s1963_s2] sm:$0xff]  }
  0x99   :  { %147 = vmatprep.subr.bf16.mxu0 %v1469_v11 }
  0x9c   :  { %148 = vmatpush1.bf16.msra.mxu0 %v1447_v3  ;;  %v1317_v3 = vld [vmem:[%s1963_s2 + $0x8] sm:$0xff]  }
  0x9d   :  { %1254 = vmatprep.subr.msk.bf16.mxu0 %vm84_vm2, %v79_v13 }
  0xa0   :  { %150 = vmatpush1.bf16.msra.mxu0 %v85_v15 }
  0xa1   :  { %1255 = vmatprep.subr.msk.bf16.mxu0 %vm84_vm2, %v83_v18 }
  0xa4   :  { %152 = vmatpush1.bf16.msra.mxu0 %v86_v12 }
  0xa5   :  { %v112_v53 = vpop.permute.xlu1 %111 }
  0xa6   :  { %v107_v11 = vpop.permute.xlu0 %106 }
  0xa7   :  { %1256 = vmatmul.mubr.msk.bf16.vlgmr.msra.gmra.mrb[0].mxu0 %vm134_vm3, %v1316_v7 }
  0xa8   :  { %183 = vmatprep.mubr.bf16.mxu0 %v1968_v10 }
  0xa9   :  { %v117_v15 = vpop.permute.xlu1 %116 }
  0xaa   :  { %v122_v48 = vpop.permute.xlu0 %121 }
  0xaf   :  { %1257 = vmatmul.mubr.msk.bf16.gmra.mrb[4].mxu0 %vm134_vm3, %v1317_v3 }
  0xb0   :  { %578 = vmatprep.mubr.bf16.mxu0 %v1968_v10 }
 0x17a   :  { %v175_v50 = vpop.f32.mrb[0].mxu0 }
 0x17b   :  { %v176_v54 = vadd.f32 %v175_v50, %v107_v11  ;;  %v177_v55 = vpop.f32.mrb[1].mxu0 }
 0x17c   :  { %v178_v56 = vadd.f32 %v177_v55, %v107_v11  ;;  %v179_v57 = vpop.f32.mrb[2].mxu0 }
 0x17d   :  { %v180_v58 = vadd.f32 %v179_v57, %v112_v53  ;;  %v181_v59 = vpop.f32.mrb[3].mxu0  ;;  %v194_v62 = vmax.f32 %v176_v54, 0.0  ;;  %v358_v54 = vpop.permute.xlu1 %357 }
 0x17e   :  { %v182_v60 = vadd.f32 %v181_v59, %v112_v53  ;;  %v195_v13 = vmax.f32 %v178_v56, 0.0 }
 0x17f   :  { %v196_v63 = vmax.f32 %v180_v58, 0.0  ;;  %v360_v58 = vpop.permute.xlu0 %359 }
 0x180   :  { %v197_v14 = vmax.f32 %v182_v60, 0.0 }
 0x181   :  { %v206_v18 = vpack.c.bf16 %v196_v63, %v194_v62  ;;  %v365_v63 = vsel %vm63_vm0, %v358_v54, %v360_v58 }
 0x182   :  { %v185_v12 = vpop.f32.mrb[4].mxu0  ;;  %v207_v7 = vpack.c.bf16 %v197_v14, %v195_v13 }
 0x183   :  { %v186_v3 = vadd.f32 %v185_v12, %v117_v15  ;;  %v187_v10 = vpop.f32.mrb[5].mxu0  ;;  %v364_v13 = vpop.permute.xlu0 %363 }
 0x184   :  { %v188_v49 = vadd.f32 %v187_v10, %v117_v15  ;;  %v189_v47 = vpop.f32.mrb[6].mxu0  ;;  %251 = vmatprep.subr.bf16.mxu1 %v207_v7  ;;  %v1318_v10 = vld [vmem:[%s1965_s4] sm:$0xff]  }
 0x185   :  { %v190_v50 = vadd.f32 %v189_v47, %v122_v48  ;;  %v191_v11 = vpop.f32.mrb[7].mxu0  ;;  %252 = vmatpush1.bf16.msra.mxu1 %v206_v18  ;;  %v198_v57 = vmax.f32 %v186_v3, 0.0  ;;  %v362_v47 = vpop.permute.xlu1 %361 }
 0x186   :  { %v192_v55 = vadd.f32 %v191_v11, %v122_v48  ;;  %v199_v56 = vmax.f32 %v188_v49, 0.0  ;;  %v366_v14 = vsel %vm63_vm0, %v362_v47, %v364_v13  ;;  %v1996_v49 = vmov 0   ;;  %v1319_v48 = vld [vmem:[%s1965_s4 + $0x8] sm:$0xff]  }
 0x187   :  { %v200_v53 = vmax.f32 %v190_v50, 0.0  ;;  %v378_v18 = vpop.permute.xlu0 %377 }
 0x188   :  { %v201_v59 = vmax.f32 %v192_v55, 0.0  ;;  %v1320_v55 = vld [vmem:[%s1963_s2] sm:$0xff]  }
 0x189   :  { %v208_v60 = vpack.c.bf16 %v200_v53, %v198_v57  ;;  %v376_v15 = vpop.permute.xlu1 %375  ;;  %v1321_v53 = vld [vmem:[%s1963_s2 + $0x8] sm:$0xff]  }
 0x18a   :  { %v209_v62 = vpack.c.bf16 %v201_v59, %v199_v56  ;;  %v383_v3 = vsel %vm84_vm2, %v376_v15, %v378_v18 }
 0x18b   :  { %v382_v7 = vpop.permute.xlu0 %381 }
 0x18c   :  { %253 = vmatprep.subr.bf16.mxu1 %v209_v62 }
 0x18d   :  { %254 = vmatpush1.bf16.msra.mxu1 %v208_v60  ;;  %v380_v12 = vpop.permute.xlu1 %379 }
 0x18e   :  { %437 = vmatprep.subr.bf16.mxu1 %v365_v63 }
 0x18f   :  { %v657_v11 = vpop.permute.xlu0 %656 }
 0x190   :  { %1260 = vmatmul.mubr.msk.bf16.vlgmr.msra.gmra.mrb[0].mxu1 %vm244_vm4, %v1318_v10 }
 0x191   :  { %1265 = vmatpush1.bf16.msk.msra.mxu1 %vm1678_vm1, %v358_v54  ;;  %293 = vmatprep.mubr.bf16.mxu1 %v1996_v49  ;;  %v655_v50 = vpop.permute.xlu1 %654 }
 0x192   :  { %439 = vmatprep.subr.bf16.mxu1 %v366_v14 }
 0x195   :  { %1267 = vmatpush1.bf16.msk.msra.mxu1 %vm1678_vm1, %v362_v47 }
 0x196   :  { %441 = vmatprep.subr.bf16.mxu1 %v1529_v22  ;;  %v384_v22 = vsel %vm84_vm2, %v380_v12, %v382_v7 }
 0x198   :  { %1261 = vmatmul.mubr.msk.bf16.gmra.mrb[4].mxu1 %vm244_vm4, %v1319_v48 }
 0x199   :  { %442 = vmatpush1.bf16.msra.mxu1 %v1524_v21  ;;  %469 = vmatprep.mubr.bf16.mxu1 %v1996_v49  ;;  %v662_v21 = vsel %vm63_vm0, %v655_v50, %v657_v11 }
 0x19a   :  { %443 = vmatprep.subr.bf16.mxu1 %v1549_v28  ;;  %v659_v28 = vpop.permute.xlu1 %658 }
 0x19d   :  { %444 = vmatpush1.bf16.msra.mxu1 %v1543_v27  ;;  %v661_v27 = vpop.permute.xlu0 %660 }
 0x19e   :  { %1268 = vmatprep.subr.msk.bf16.mxu1 %vm84_vm2, %v378_v18  ;;  %v663_v57 = vsel %vm63_vm0, %v659_v28, %v661_v27  ;;  %v673_v54 = vpop.permute.xlu1 %672 }
 0x1a1   :  { %446 = vmatpush1.bf16.msra.mxu1 %v383_v3  ;;  %v675_v58 = vpop.permute.xlu0 %674 }
 0x1a2   :  { %1269 = vmatprep.subr.msk.bf16.mxu1 %vm84_vm2, %v382_v7  ;;  %v680_v56 = vsel %vm84_vm2, %v673_v54, %v675_v58  ;;  %v677_v59 = vpop.permute.xlu1 %676 }
 0x1a5   :  { %448 = vmatpush1.bf16.msra.mxu1 %v384_v22  ;;  %v679_v60 = vpop.permute.xlu0 %678 }
 0x1a6   :  { %734 = vmatprep.subr.bf16.mxu1 %v662_v21 }
 0x1a8   :  { %1270 = vmatmul.mubr.msk.bf16.vlgmr.msra.gmra.mrb[8].mxu1 %vm134_vm3, %v1320_v55  ;;  %v314_v55 = vlaneseq }
 0x1a9   :  { %1280 = vmatpush1.bf16.msk.msra.mxu1 %vm1678_vm1, %v655_v50  ;;  %479 = vmatprep.mubr.bf16.mxu1 %v1996_v49  ;;  %v1766_v62 = vpop.permute.xlu0 %408 }
 0x1aa   :  { %736 = vmatprep.subr.bf16.mxu1 %v663_v57  ;;  %v315_v27 = vshrl.u32 %v314_v55, 7 }
 0x1ac   :  { %v1804_v54 = vsub.s32 0, %v315_v27 }
 0x1ad   :  { %1282 = vmatpush1.bf16.msk.msra.mxu1 %vm1678_vm1, %v659_v28  ;;  %v1770_v10 = vpop.permute.xlu0 %418 }
 0x1ae   :  { %738 = vmatprep.subr.bf16.mxu1 %v1577_v34  ;;  %v681_v34 = vsel %vm84_vm2, %v677_v59, %v679_v60 }
 0x1b0   :  { %1271 = vmatmul.mubr.msk.bf16.gmra.mrb[12].mxu1 %vm134_vm3, %v1321_v53 }
 0x1b1   :  { %739 = vmatpush1.bf16.msra.mxu1 %v1571_v33  ;;  %766 = vmatprep.mubr.bf16.mxu1 %v1996_v49  ;;  %v1322_v33 = vld [vmem:[%s1963_s2] sm:$0xff]   ;;  %v1774_v13 = vpop.permute.xlu0 %705 }
 0x1b2   :  { %740 = vmatprep.subr.bf16.mxu1 %v1597_v40  ;;  %v1764_v40 = vpop.permute.xlu1 %403 }
 0x1b5   :  { %741 = vmatpush1.bf16.msra.mxu1 %v1591_v39  ;;  %v1323_v39 = vld [vmem:[%s1963_s2 + $0x8] sm:$0xff]   ;;  %v1778_v15 = vpop.permute.xlu0 %715 }
 0x1b6   :  { %1283 = vmatprep.subr.msk.bf16.mxu1 %vm84_vm2, %v675_v58  ;;  %v1768_v63 = vpop.permute.xlu1 %413  ;;  %v312_v58 = vld [vmem:[%s1962_s1] sm:$0x3] }
 0x1b9   :  { %743 = vmatpush1.bf16.msra.mxu1 %v680_v56  ;;  %v1782_v48 = vpop.permute.xlu0 %953  ;;  %v1809_v56 = vsub.s32 1, %v315_v27 }
 0x1ba   :  { %1284 = vmatprep.subr.msk.bf16.mxu1 %vm84_vm2, %v679_v60  ;;  %v1772_v47 = vpop.permute.xlu1 %700 }
 0x1bb   :  { %v321_v42 = vrot.slane %v312_v58, %v1809_v56 }
 0x1bd   :  { %745 = vmatpush1.bf16.msra.mxu1 %v681_v34  ;;  %v1786_v7 = vpop.permute.xlu0 %957 }
 0x1be   :  { %v1776_v14 = vpop.permute.xlu1 %710 }
 0x1c0   :  { %1285 = vmatmul.mubr.msk.bf16.vlgmr.msra.gmra.mrb[16].mxu1 %vm134_vm3, %v1322_v33  ;;  %v317_v33 = vrot.slane %v312_v58, %v1804_v54 }
 0x1c1   :  { %776 = vmatprep.mubr.bf16.mxu1 %v1996_v49  ;;  %v1790_v50 = vpop.permute.xlu0 %971 }
 0x1c2   :  { %v1780_v18 = vpop.permute.xlu1 %951 }
 0x1c5   :  { %v1794_v22 = vpop.permute.xlu0 %975 }
 0x1c6   :  { %v1784_v12 = vpop.permute.xlu1 %955 }
 0x1c8   :  { %1286 = vmatmul.mubr.msk.bf16.gmra.mrb[20].mxu1 %vm134_vm3, %v1323_v39 }
 0x1c9   :  { %1172 = vmatprep.mubr.bf16.mxu1 %v1996_v49  ;;  %v1798_v28 = vpop.permute.xlu0 %1002 }
 0x1ca   :  { %v1788_v3 = vpop.permute.xlu1 %969  ;;  %1998 = vst [vmem:[#allocation19_spill] sm:$0xff] %v1798_v28 }
 0x1cd   :  { %v1802_v53 = vpop.permute.xlu0 %1012 }
 0x1ce   :  { %v1792_v11 = vpop.permute.xlu1 %973  ;;  %2000 = vst [vmem:[#allocation21_spill] sm:$0xff] %v1802_v53 }
 0x1d1   :  { %v222_v44 = vpop.permute.xlu0 %221 }
 0x1d2   :  { %v1796_v21 = vpop.permute.xlu1 %997 }
 0x1d3   :  { %1997 = vst [vmem:[#allocation18_spill] sm:$0xff] %v1796_v21 }
 0x1d6   :  { %v1800_v57 = vpop.permute.xlu1 %1007 }
 0x1d7   :  { %1999 = vst [vmem:[#allocation20_spill] sm:$0xff] %v1800_v57 }
 0x1da   :  { %v217_v59 = vpop.permute.xlu1 %216 }
 0x1de   :  { %v227_v35 = vpop.permute.xlu1 %226 }
 0x1e2   :  { %v513_v61 = vpop.permute.xlu1 %512 }
 0x263   :  { %v285_v60 = vpop.f32.mrb[0].mxu1 }
 0x264   :  { %v286_v34 = vadd.f32 %v285_v60, %v217_v59  ;;  %v287_v39 = vpop.f32.mrb[1].mxu1 }
 0x265   :  { %v288_v55 = vadd.f32 %v287_v39, %v217_v59  ;;  %v289_v43 = vpop.f32.mrb[2].mxu1 }
 0x266   :  { %v304_v41 = vadd.f32 %v286_v34, %v1443_v2  ;;  %v290_v53 = vadd.f32 %v289_v43, %v222_v44  ;;  %v291_v57 = vpop.f32.mrb[3].mxu1  ;;  %v232_v43 = vpop.permute.xlu0 %231 }
 0x267   :  { %v305_v28 = vadd.f32 %v288_v55, %v1459_v8  ;;  %v292_v21 = vadd.f32 %v291_v57, %v222_v44 }
 0x268   :  { %v324_v27 = vmul.f32 %v317_v33, %v304_v41  ;;  %v306_v38 = vadd.f32 %v290_v53, %v1449_v4 }
 0x269   :  { %v325_v36 = vmul.f32 %v321_v42, %v305_v28  ;;  %v307_v60 = vadd.f32 %v292_v21, %v1461_v9 }
 0x26a   :  { %332 = vst [vmem:[#allocation5] sm:$0xff] %v324_v27  ;;  %v326_v37 = vmul.f32 %v317_v33, %v306_v38 }
 0x26b   :  { %333 = vst [vmem:[#allocation5 + $0x8] sm:$0xff] %v325_v36  ;;  %v327_v59 = vmul.f32 %v321_v42, %v307_v60  ;;  %v295_v58 = vpop.f32.mrb[4].mxu1 }
 0x26c   :  { %334 = vst [vmem:[#allocation5 + $0x10] sm:$0xff] %v326_v37  ;;  %v296_v39 = vadd.f32 %v295_v58, %v227_v35  ;;  %v297_v2 = vpop.f32.mrb[5].mxu1 }
 0x26d   :  { %335 = vst [vmem:[#allocation5 + $0x18] sm:$0xff] %v327_v59  ;;  %v298_v34 = vadd.f32 %v297_v2, %v227_v35  ;;  %v299_v8 = vpop.f32.mrb[6].mxu1 }
 0x26e   :  { %v308_v41 = vadd.f32 %v296_v39, %v1439_v0  ;;  %v300_v44 = vadd.f32 %v299_v8, %v232_v43  ;;  %v301_v4 = vpop.f32.mrb[7].mxu1 }
 0x26f   :  { %v309_v28 = vadd.f32 %v298_v34, %v1451_v5  ;;  %v302_v9 = vadd.f32 %v301_v4, %v232_v43 }
 0x270   :  { %v328_v21 = vmul.f32 %v317_v33, %v308_v41  ;;  %v310_v38 = vadd.f32 %v300_v44, %v1441_v1 }
 0x271   :  { %v329_v36 = vmul.f32 %v321_v42, %v309_v28  ;;  %v311_v57 = vadd.f32 %v302_v9, %v1453_v6 }
 0x272   :  { %336 = vst [vmem:[#allocation5 + $0x20] sm:$0xff] %v328_v21  ;;  %v330_v37 = vmul.f32 %v317_v33, %v310_v38 }
 0x273   :  { %337 = vst [vmem:[#allocation5 + $0x28] sm:$0xff] %v329_v36  ;;  %v331_v53 = vmul.f32 %v321_v42, %v311_v57 }
 0x274   :  { %338 = vst [vmem:[#allocation5 + $0x30] sm:$0xff] %v330_v37  ;;  %v1324_v37 = vld [vmem:[%s1965_s4] sm:$0xff]  }
 0x275   :  { %339 = vst [vmem:[#allocation5 + $0x38] sm:$0xff] %v331_v53 }
 0x27b   :  { %v471_v35 = vpop.f32.mrb[8].mxu1 }
 0x27c   :  { %v472_v0 = vadd.f32 %v471_v35, %v1764_v40  ;;  %v473_v55 = vpop.f32.mrb[9].mxu1 }
 0x27d   :  { %v474_v27 = vadd.f32 %v473_v55, %v1764_v40  ;;  %v475_v5 = vpop.f32.mrb[10].mxu1  ;;  %v1325_v55 = vld [vmem:[%s1965_s4 + $0x8] sm:$0xff]  }
 0x27e   :  { %v476_v60 = vadd.f32 %v475_v5, %v1766_v62  ;;  %v477_v59 = vpop.f32.mrb[11].mxu1  ;;  %v490_v58 = vmax.f32 %v472_v0, 0.0 }
 0x27f   :  { %v478_v1 = vadd.f32 %v477_v59, %v1766_v62  ;;  %v491_v39 = vmax.f32 %v474_v27, 0.0 }
 0x280   :  { %v492_v6 = vmax.f32 %v476_v60, 0.0 }
 0x281   :  { %v493_v33 = vmax.f32 %v478_v1, 0.0 }
 0x282   :  { %v502_v2 = vpack.c.bf16 %v492_v6, %v490_v58 }
 0x283   :  { %v503_v42 = vpack.c.bf16 %v493_v33, %v491_v39  ;;  %v481_v43 = vpop.f32.mrb[12].mxu1 }
 0x284   :  { %v482_v34 = vadd.f32 %v481_v43, %v1768_v63  ;;  %v483_v8 = vpop.f32.mrb[13].mxu1 }
 0x285   :  { %v484_v41 = vadd.f32 %v483_v8, %v1768_v63  ;;  %v485_v44 = vpop.f32.mrb[14].mxu1  ;;  %546 = vmatprep.subr.bf16.mxu0 %v503_v42 }
 0x286   :  { %v486_v40 = vadd.f32 %v485_v44, %v1770_v10  ;;  %v487_v4 = vpop.f32.mrb[15].mxu1  ;;  %547 = vmatpush1.bf16.msra.mxu0 %v502_v2  ;;  %v494_v28 = vmax.f32 %v482_v34, 0.0 }
 0x287   :  { %v488_v62 = vadd.f32 %v487_v4, %v1770_v10  ;;  %v495_v21 = vmax.f32 %v484_v41, 0.0 }
 0x288   :  { %v496_v9 = vmax.f32 %v486_v40, 0.0 }
 0x289   :  { %v497_v38 = vmax.f32 %v488_v62, 0.0 }
 0x28a   :  { %v504_v36 = vpack.c.bf16 %v496_v9, %v494_v28 }
 0x28b   :  { %v505_v57 = vpack.c.bf16 %v497_v38, %v495_v21  ;;  %v959_v21 = vsel %vm63_vm0, %v1780_v18, %v1782_v48  ;;  %v1327_v48 = vld [vmem:[%s1965_s4 + $0x8] sm:$0xff]  }
 0x28d   :  { %548 = vmatprep.subr.bf16.mxu0 %v505_v57 }
 0x28e   :  { %549 = vmatpush1.bf16.msra.mxu0 %v504_v36 }
 0x291   :  { %1274 = vmatmul.mubr.msk.bf16.vlgmr.msra.gmra.mrb[8].mxu0 %vm244_vm4, %v1324_v37 }
 0x292   :  { %588 = vmatprep.mubr.bf16.mxu0 %v1996_v49 }
 0x293   :  { %v768_v63 = vpop.f32.mrb[16].mxu1 }
 0x294   :  { %v769_v53 = vadd.f32 %v768_v63, %v1772_v47  ;;  %v770_v10 = vpop.f32.mrb[17].mxu1 }
 0x295   :  { %v771_v35 = vadd.f32 %v770_v10, %v1772_v47  ;;  %v772_v0 = vpop.f32.mrb[18].mxu1 }
 0x296   :  { %v773_v27 = vadd.f32 %v772_v0, %v1774_v13  ;;  %v774_v5 = vpop.f32.mrb[19].mxu1  ;;  %v787_v59 = vmax.f32 %v769_v53, 0.0 }
 0x297   :  { %v775_v60 = vadd.f32 %v774_v5, %v1774_v13  ;;  %v788_v58 = vmax.f32 %v771_v35, 0.0 }
 0x298   :  { %v789_v1 = vmax.f32 %v773_v27, 0.0 }
 0x299   :  { %v790_v6 = vmax.f32 %v775_v60, 0.0  ;;  %1275 = vmatmul.mubr.msk.bf16.gmra.mrb[12].mxu0 %vm244_vm4, %v1325_v55  ;;  %v523_v60 = vpop.permute.xlu1 %522 }
 0x29a   :  { %v799_v39 = vpack.c.bf16 %v789_v1, %v787_v59  ;;  %875 = vmatprep.mubr.bf16.mxu0 %v1996_v49 }
 0x29b   :  { %v800_v47 = vpack.c.bf16 %v790_v6, %v788_v58  ;;  %v778_v33 = vpop.f32.mrb[20].mxu1 }
 0x29c   :  { %v779_v2 = vadd.f32 %v778_v33, %v1776_v14  ;;  %v780_v42 = vpop.f32.mrb[21].mxu1 }
 0x29d   :  { %v781_v43 = vadd.f32 %v780_v42, %v1776_v14  ;;  %v782_v34 = vpop.f32.mrb[22].mxu1  ;;  %843 = vmatprep.subr.bf16.mxu0 %v800_v47  ;;  %v1326_v14 = vld [vmem:[%s1965_s4] sm:$0xff]  }
 0x29e   :  { %v783_v13 = vadd.f32 %v782_v34, %v1778_v15  ;;  %v784_v8 = vpop.f32.mrb[23].mxu1  ;;  %844 = vmatpush1.bf16.msra.mxu0 %v799_v39  ;;  %v791_v44 = vmax.f32 %v779_v2, 0.0 }
 0x29f   :  { %v785_v41 = vadd.f32 %v784_v8, %v1778_v15  ;;  %v792_v4 = vmax.f32 %v781_v43, 0.0  ;;  %v960_v15 = vsel %vm63_vm0, %v1784_v12, %v1786_v7 }
 0x2a0   :  { %v793_v40 = vmax.f32 %v783_v13, 0.0 }
 0x2a1   :  { %v794_v62 = vmax.f32 %v785_v41, 0.0 }
 0x2a2   :  { %v801_v28 = vpack.c.bf16 %v793_v40, %v791_v44  ;;  %v810_v44 = vpop.permute.xlu1 %809 }
 0x2a3   :  { %v802_v9 = vpack.c.bf16 %v794_v62, %v792_v4 }
 0x2a5   :  { %845 = vmatprep.subr.bf16.mxu0 %v802_v9 }
 0x2a6   :  { %846 = vmatpush1.bf16.msra.mxu0 %v801_v28 }
 0x2a7   :  { %1031 = vmatprep.subr.bf16.mxu0 %v959_v21 }
 0x2a9   :  { %1289 = vmatmul.mubr.msk.bf16.vlgmr.msra.gmra.mrb[16].mxu0 %vm244_vm4, %v1326_v14 }
 0x2aa   :  { %1295 = vmatpush1.bf16.msk.msra.mxu0 %vm1678_vm1, %v1780_v18  ;;  %885 = vmatprep.mubr.bf16.mxu0 %v1996_v49  ;;  %v977_v18 = vsel %vm84_vm2, %v1788_v3, %v1790_v50 }
 0x2ab   :  { %1033 = vmatprep.subr.bf16.mxu0 %v960_v15 }
 0x2ae   :  { %1297 = vmatpush1.bf16.msk.msra.mxu0 %vm1678_vm1, %v1784_v12 }
 0x2af   :  { %1035 = vmatprep.subr.bf16.mxu0 %v1633_v46  ;;  %v978_v46 = vsel %vm84_vm2, %v1792_v11, %v1794_v22  ;;  %v518_v11 = vpop.permute.xlu0 %517 }
 0x2b1   :  { %1290 = vmatmul.mubr.msk.bf16.gmra.mrb[20].mxu0 %vm244_vm4, %v1327_v48 }
 0x2b2   :  { %1036 = vmatpush1.bf16.msra.mxu0 %v1628_v45  ;;  %1063 = vmatprep.mubr.bf16.mxu0 %v1996_v49  ;;  %v1328_v45 = vld [vmem:[%s1963_s2] sm:$0xff]  }
 0x2b3   :  { %1037 = vmatprep.subr.bf16.mxu0 %v1647_v52  ;;  %v1276_v52 = vld [vmem:[%s1962_s1 + $0x2] sm:$0x3]  ;;  %v528_v6 = vpop.permute.xlu0 %527 }
 0x2b4   :  { %v613_v3 = vrot.slane %v1276_v52, %v1804_v54  ;;  %v617_v38 = vrot.slane %v1276_v52, %v1809_v56 }
 0x2b6   :  { %1038 = vmatpush1.bf16.msra.mxu0 %v1642_v51  ;;  %v1329_v51 = vld [vmem:[%s1963_s2 + $0x8] sm:$0xff]  }
 0x2b7   :  { %1298 = vmatprep.subr.msk.bf16.mxu0 %vm84_vm2, %v1790_v50 }
 0x2ba   :  { %1040 = vmatpush1.bf16.msra.mxu0 %v977_v18 }
 0x2bb   :  { %1299 = vmatprep.subr.msk.bf16.mxu0 %vm84_vm2, %v1794_v22 }
 0x2be   :  { %1042 = vmatpush1.bf16.msra.mxu0 %v978_v46 }
 0x2c1   :  { %1300 = vmatmul.mubr.msk.bf16.vlgmr.msra.gmra.mrb[24].mxu0 %vm134_vm3, %v1328_v45 }
 0x2c2   :  { %1073 = vmatprep.mubr.bf16.mxu0 %v1996_v49 }
 0x2c9   :  { %1301 = vmatmul.mubr.msk.bf16.gmra.mrb[28].mxu0 %vm134_vm3, %v1329_v51 }
 0x364   :  { %v580_v12 = vpop.f32.mrb[8].mxu0 }
 0x365   :  { %v581_v7 = vadd.f32 %v580_v12, %v513_v61  ;;  %v582_v50 = vpop.f32.mrb[9].mxu0  ;;  %v820_v12 = vpop.permute.xlu1 %819 }
 0x366   :  { %v583_v22 = vadd.f32 %v582_v50, %v513_v61  ;;  %v584_v36 = vpop.f32.mrb[10].mxu0 }
 0x367   :  { %v599_v57 = vadd.f32 %v581_v7, %v1508_v16  ;;  %v585_v37 = vadd.f32 %v584_v36, %v518_v11  ;;  %v586_v63 = vpop.f32.mrb[11].mxu0 }
 0x368   :  { %v600_v53 = vadd.f32 %v583_v22, %v1517_v19  ;;  %v587_v10 = vadd.f32 %v586_v63, %v518_v11 }
 0x369   :  { %v620_v35 = vmul.f32 %v613_v3, %v599_v57  ;;  %v601_v0 = vadd.f32 %v585_v37, %v1510_v17  ;;  %v2002_v37 = vld [vmem:[#allocation10_spill] sm:$0xff] }
 0x36a   :  { %v621_v55 = vmul.f32 %v617_v38, %v600_v53  ;;  %v602_v27 = vadd.f32 %v587_v10, %v1519_v20  ;;  %v2003_v10 = vld [vmem:[#allocation9_spill] sm:$0xff] }
 0x36b   :  { %629 = vst [vmem:[#allocation5 + $0x40] sm:$0xff] %v620_v35  ;;  %v622_v5 = vmul.f32 %v613_v3, %v601_v0 }
 0x36c   :  { %630 = vst [vmem:[#allocation5 + $0x48] sm:$0xff] %v621_v55  ;;  %v623_v59 = vmul.f32 %v617_v38, %v602_v27  ;;  %v590_v1 = vpop.f32.mrb[12].mxu0  ;;  %v2004_v55 = vld [vmem:[#allocation11_spill] sm:$0xff] }
 0x36d   :  { %631 = vst [vmem:[#allocation5 + $0x50] sm:$0xff] %v622_v5  ;;  %v591_v58 = vadd.f32 %v590_v1, %v523_v60  ;;  %v592_v16 = vpop.f32.mrb[13].mxu0  ;;  %v2005_v1 = vld [vmem:[#allocation18_spill] sm:$0xff] }
 0x36e   :  { %632 = vst [vmem:[#allocation5 + $0x58] sm:$0xff] %v623_v59  ;;  %v593_v39 = vadd.f32 %v592_v16, %v523_v60  ;;  %v594_v19 = vpop.f32.mrb[14].mxu0 }
 0x36f   :  { %v603_v47 = vadd.f32 %v591_v58, %v1531_v23  ;;  %v595_v33 = vadd.f32 %v594_v19, %v528_v6  ;;  %v596_v17 = vpop.f32.mrb[15].mxu0  ;;  %v1291_v23 = vld [vmem:[%s1962_s1 + $0x4] sm:$0x3]  ;;  %v2006_v19 = vld [vmem:[#allocation19_spill] sm:$0xff] }
 0x370   :  { %v604_v2 = vadd.f32 %v593_v39, %v1535_v25  ;;  %v597_v20 = vadd.f32 %v596_v17, %v528_v6  ;;  %v910_v4 = vrot.slane %v1291_v23, %v1804_v54 }
 0x371   :  { %v624_v42 = vmul.f32 %v613_v3, %v603_v47  ;;  %v605_v43 = vadd.f32 %v595_v33, %v1533_v24  ;;  %v815_v24 = vpop.permute.xlu0 %814 }
 0x372   :  { %v625_v34 = vmul.f32 %v617_v38, %v604_v2  ;;  %v606_v13 = vadd.f32 %v597_v20, %v1537_v26  ;;  %v914_v26 = vrot.slane %v1291_v23, %v1809_v56 }
 0x373   :  { %633 = vst [vmem:[#allocation5 + $0x60] sm:$0xff] %v624_v42  ;;  %v626_v8 = vmul.f32 %v613_v3, %v605_v43 }
 0x374   :  { %634 = vst [vmem:[#allocation5 + $0x68] sm:$0xff] %v625_v34  ;;  %v627_v41 = vmul.f32 %v617_v38, %v606_v13  ;;  %v2001_v38 = vld [vmem:[#allocation8_spill] sm:$0xff] }
 0x375   :  { %635 = vst [vmem:[#allocation5 + $0x70] sm:$0xff] %v626_v8  ;;  %v825_v11 = vpop.permute.xlu0 %824 }
 0x376   :  { %636 = vst [vmem:[#allocation5 + $0x78] sm:$0xff] %v627_v41  ;;  %v2007_v41 = vld [vmem:[#allocation20_spill] sm:$0xff] }
 0x37c   :  { %v877_v40 = vpop.f32.mrb[16].mxu0 }
 0x37d   :  { %v878_v25 = vadd.f32 %v877_v40, %v810_v44  ;;  %v879_v62 = vpop.f32.mrb[17].mxu0 }
 0x37e   :  { %v880_v28 = vadd.f32 %v879_v62, %v810_v44  ;;  %v881_v9 = vpop.f32.mrb[18].mxu0 }
 0x37f   :  { %v896_v21 = vadd.f32 %v878_v25, %v1559_v29  ;;  %v882_v14 = vadd.f32 %v881_v9, %v815_v24  ;;  %v883_v15 = vpop.f32.mrb[19].mxu0 }
 0x380   :  { %v897_v48 = vadd.f32 %v880_v28, %v1563_v31  ;;  %v884_v18 = vadd.f32 %v883_v15, %v815_v24 }
 0x381   :  { %v917_v46 = vmul.f32 %v910_v4, %v896_v21  ;;  %v898_v45 = vadd.f32 %v882_v14, %v1561_v30 }
 0x382   :  { %v918_v51 = vmul.f32 %v914_v26, %v897_v48  ;;  %v899_v52 = vadd.f32 %v884_v18, %v1565_v32  ;;  %v1330_v18 = vld [vmem:[%s1965_s4] sm:$0xff]  }
 0x383   :  { %926 = vst [vmem:[#allocation5 + $0x80] sm:$0xff] %v917_v46  ;;  %v919_v61 = vmul.f32 %v910_v4, %v898_v45  ;;  %v1331_v46 = vld [vmem:[%s1965_s4 + $0x8] sm:$0xff]   ;;  %v1306_v45 = vld [vmem:[%s1962_s1 + $0x6] sm:$0x3]  ;;  %s1388_s1 = smov [#allocation5]  }
 0x384   :  { %927 = vst [vmem:[#allocation5 + $0x88] sm:$0xff] %v918_v51  ;;  %v920_v7 = vmul.f32 %v914_v26, %v899_v52  ;;  %v887_v3 = vpop.f32.mrb[20].mxu0  ;;  %v1107_v51 = vpop.permute.xlu1 %1106  ;;  %s1236_s4 = sshll.u32 %s1388_s1, 4  ;;  %s1237_s4 = int_to_ptr.vmem [resolvable:$true] %s1236_s4 }
 0x385   :  { %928 = vst [vmem:[#allocation5 + $0x90] sm:$0xff] %v919_v61  ;;  %v888_v50 = vadd.f32 %v887_v3, %v820_v12  ;;  %v889_v29 = vpop.f32.mrb[21].mxu0  ;;  %v1112_v3 = vpop.permute.xlu0 %1111  ;;  %s1356_s17 = scalar_lea.vmem %s1237_s4, 4096  ;;  %p1361_p9 = scmp.lt.s32.totalorder %s1237_s4, %s1237_s4 }
 0x386   :  { %929 = vst [vmem:[#allocation5 + $0x98] sm:$0xff] %v920_v7  ;;  %v890_v22 = vadd.f32 %v889_v29, %v820_v12  ;;  %v891_v31 = vpop.f32.mrb[22].mxu0  ;;  %v1207_v12 = vrot.slane %v1306_v45, %v1804_v54  ;;  %p1357_p8 = scmp.ne.s32.totalorder %s1237_s4, %s1356_s17  ;;  %p1362_p10 = scmp.lt.s32.totalorder %s1356_s17, %s1356_s17 }
 0x387   :  { %v900_v36 = vadd.f32 %v888_v50, %v2001_v38  ;;  %v892_v57 = vadd.f32 %v891_v31, %v825_v11  ;;  %v893_v30 = vpop.f32.mrb[23].mxu0 }
 0x388   :  { %v901_v63 = vadd.f32 %v890_v22, %v2002_v37  ;;  %v894_v32 = vadd.f32 %v893_v30, %v825_v11  ;;  %v2009_v11 = vld [vmem:[#allocation12_spill] sm:$0xff]  ;;  %p1363_p11 = por %p1362_p10, %p1361_p9 }
 0x389   :  { %v921_v53 = vmul.f32 %v910_v4, %v900_v36  ;;  %v902_v35 = vadd.f32 %v892_v57, %v2003_v10  ;;  %v2010_v36 = vld [vmem:[#allocation14_spill] sm:$0xff]  ;;  %v2012_v10 = vld [vmem:[#allocation15_spill] sm:$0xff] }
 0x38a   :  { %v922_v0 = vmul.f32 %v914_v26, %v901_v63  ;;  %v903_v27 = vadd.f32 %v894_v32, %v2004_v55  ;;  %v2011_v63 = vld [vmem:[#allocation13_spill] sm:$0xff]  ;;  %p1364_p12 = pnand %p1363_p11, %p1357_p8 }
 0x38b   :  { %930 = vst [vmem:[#allocation5 + $0xa0] sm:$0xff] %v921_v53  ;;  %v923_v5 = vmul.f32 %v910_v4, %v902_v35  ;;  %v2008_v4 = vld [vmem:[#allocation21_spill] sm:$0xff] }
 0x38c   :  { %931 = vst [vmem:[#allocation5 + $0xa8] sm:$0xff] %v922_v0  ;;  %v924_v60 = vmul.f32 %v914_v26, %v903_v27  ;;  %v1117_v0 = vpop.permute.xlu1 %1116 }
 0x38d   :  { %932 = vst [vmem:[#allocation5 + $0xb0] sm:$0xff] %v923_v5 }
 0x38e   :  { %933 = vst [vmem:[#allocation5 + $0xb8] sm:$0xff] %v924_v60  ;;  %v1122_v60 = vpop.permute.xlu0 %1121 }
 0x394   :  { %v1065_v59 = vpop.f32.mrb[24].mxu0 }
 0x395   :  { %v1066_v58 = vadd.f32 %v1065_v59, %v2005_v1  ;;  %v1067_v16 = vpop.f32.mrb[25].mxu0 }
 0x396   :  { %v1068_v6 = vadd.f32 %v1067_v16, %v2005_v1  ;;  %v1069_v39 = vpop.f32.mrb[26].mxu0 }
 0x397   :  { %v1070_v47 = vadd.f32 %v1069_v39, %v2006_v19  ;;  %v1071_v33 = vpop.f32.mrb[27].mxu0  ;;  %v1084_v2 = vmax.f32 %v1066_v58, 0.0  ;;  %v2013_v58 = vld [vmem:[#allocation16_spill] sm:$0xff] }
 0x398   :  { %v1072_v17 = vadd.f32 %v1071_v33, %v2006_v19  ;;  %v1085_v42 = vmax.f32 %v1068_v6, 0.0  ;;  %v2014_v19 = vld [vmem:[#allocation17_spill] sm:$0xff] }
 0x399   :  { %v1086_v20 = vmax.f32 %v1070_v47, 0.0 }
 0x39a   :  { %v1087_v43 = vmax.f32 %v1072_v17, 0.0 }
 0x39b   :  { %v1096_v34 = vpack.c.bf16 %v1086_v20, %v1084_v2  ;;  %v1332_v2 = vld [vmem:[#allocation2 + $0xf0] sm:$0xff] }
 0x39c   :  { %v1097_v13 = vpack.c.bf16 %v1087_v43, %v1085_v42  ;;  %v1075_v8 = vpop.f32.mrb[28].mxu0  ;;  %v1333_v43 = vld [vmem:[#allocation2 + $0xf8] sm:$0xff] }
 0x39d   :  { %v1076_v23 = vadd.f32 %v1075_v8, %v2007_v41  ;;  %v1077_v44 = vpop.f32.mrb[29].mxu0 }
 0x39e   :  { %v1078_v40 = vadd.f32 %v1077_v44, %v2007_v41  ;;  %v1079_v25 = vpop.f32.mrb[30].mxu0  ;;  %1140 = vmatprep.subr.bf16.mxu1 %v1097_v13 }
 0x39f   :  { %v1080_v62 = vadd.f32 %v1079_v25, %v2008_v4  ;;  %v1081_v24 = vpop.f32.mrb[31].mxu0  ;;  %1141 = vmatpush1.bf16.msra.mxu1 %v1096_v34  ;;  %v1088_v26 = vmax.f32 %v1076_v23, 0.0 }
 0x3a0   :  { %v1082_v28 = vadd.f32 %v1081_v24, %v2008_v4  ;;  %v1089_v21 = vmax.f32 %v1078_v40, 0.0 }
 0x3a1   :  { %v1090_v9 = vmax.f32 %v1080_v62, 0.0 }
 0x3a2   :  { %v1091_v14 = vmax.f32 %v1082_v28, 0.0 }
 0x3a3   :  { %v1098_v15 = vpack.c.bf16 %v1090_v9, %v1088_v26 }
 0x3a4   :  { %v1099_v48 = vpack.c.bf16 %v1091_v14, %v1089_v21 }
 0x3a6   :  { %1142 = vmatprep.subr.bf16.mxu1 %v1099_v48 }
 0x3a7   :  { %1143 = vmatpush1.bf16.msra.mxu1 %v1098_v15 }
 0x3aa   :  { %1304 = vmatmul.mubr.msk.bf16.vlgmr.msra.gmra.mrb[24].mxu1 %vm244_vm4, %v1330_v18 }
 0x3ab   :  { %1182 = vmatprep.mubr.bf16.mxu1 %v1996_v49  ;;  %v1211_v49 = vrot.slane %v1306_v45, %v1809_v56 }
 0x3b2   :  { %1305 = vmatmul.mubr.msk.bf16.gmra.mrb[28].mxu1 %vm244_vm4, %v1331_v46 }
 0x47d   :  { %v1174_v52 = vpop.f32.mrb[24].mxu1 }
 0x47e   :  { %v1175_v61 = vadd.f32 %v1174_v52, %v1107_v51  ;;  %v1176_v7 = vpop.f32.mrb[25].mxu1 }
 0x47f   :  { %v1177_v50 = vadd.f32 %v1176_v7, %v1107_v51  ;;  %v1178_v29 = vpop.f32.mrb[26].mxu1 }
 0x480   :  { %v1193_v22 = vadd.f32 %v1175_v61, %v2009_v11  ;;  %v1179_v31 = vadd.f32 %v1178_v29, %v1112_v3  ;;  %v1180_v38 = vpop.f32.mrb[27].mxu1 }
 0x481   :  { %v1194_v57 = vadd.f32 %v1177_v50, %v2010_v36  ;;  %v1181_v30 = vadd.f32 %v1180_v38, %v1112_v3 }
 0x482   :  { %v1214_v37 = vmul.f32 %v1207_v12, %v1193_v22  ;;  %v1195_v32 = vadd.f32 %v1179_v31, %v2011_v63 }
 0x483   :  { %v1215_v53 = vmul.f32 %v1211_v49, %v1194_v57  ;;  %v1196_v35 = vadd.f32 %v1181_v30, %v2012_v10 }
 0x484   :  { %1223 = vst [vmem:[#allocation5 + $0xc0] sm:$0xff] %v1214_v37  ;;  %v1216_v54 = vmul.f32 %v1207_v12, %v1195_v32 }
 0x485   :  { %1224 = vst [vmem:[#allocation5 + $0xc8] sm:$0xff] %v1215_v53  ;;  %v1217_v55 = vmul.f32 %v1211_v49, %v1196_v35  ;;  %v1184_v56 = vpop.f32.mrb[28].mxu1 }
 0x486   :  { %1225 = vst [vmem:[#allocation5 + $0xd0] sm:$0xff] %v1216_v54  ;;  %v1185_v27 = vadd.f32 %v1184_v56, %v1117_v0  ;;  %v1186_v5 = vpop.f32.mrb[29].mxu1 }
 0x487   :  { %1226 = vst [vmem:[#allocation5 + $0xd8] sm:$0xff] %v1217_v55  ;;  %v1187_v59 = vadd.f32 %v1186_v5, %v1117_v0  ;;  %v1188_v1 = vpop.f32.mrb[30].mxu1 }
 0x488   :  { %v1197_v16 = vadd.f32 %v1185_v27, %v2013_v58  ;;  %v1189_v6 = vadd.f32 %v1188_v1, %v1122_v60  ;;  %v1190_v39 = vpop.f32.mrb[31].mxu1 }
 0x489   :  { %v1198_v47 = vadd.f32 %v1187_v59, %v2014_v19  ;;  %v1191_v33 = vadd.f32 %v1190_v39, %v1122_v60 }
 0x48a   :  { %v1218_v17 = vmul.f32 %v1207_v12, %v1197_v16  ;;  %v1199_v20 = vadd.f32 %v1332_v2, %v1189_v6 }
 0x48b   :  { %v1219_v42 = vmul.f32 %v1211_v49, %v1198_v47  ;;  %v1200_v34 = vadd.f32 %v1333_v43, %v1191_v33 }
 0x48c   :  { %1227 = vst [vmem:[#allocation5 + $0xe0] sm:$0xff] %v1218_v17  ;;  %v1220_v13 = vmul.f32 %v1207_v12, %v1199_v20 }
 0x48d   :  { %1228 = vst [vmem:[#allocation5 + $0xe8] sm:$0xff] %v1219_v42  ;;  %v1221_v8 = vmul.f32 %v1211_v49, %v1200_v34 }
 0x48e   :  { %1229 = vst [vmem:[#allocation5 + $0xf0] sm:$0xff] %v1220_v13 }
 0x48f   :  { %1230 = vst [vmem:[#allocation5 + $0xf8] sm:$0xff] %v1221_v8 }
 0x490   :  { %1367 = shalt.err (!%p1364_p12)
}
 0x491   :  { %s1368_s3 = scalar_lea.hbm %s1967_s6, 4096 }
 0x492   :  { %p1369_p13 = scmp.ne.s32.totalorder %s1967_s6, %s1368_s3  ;;  %p1372_p0 = scmp.lt.u32.totalorder %s1368_s3, %s1967_s6 }
 0x494   :  { %p1374_p1 = pnand %p1372_p0, %p1369_p13 }
 0x496   :  { %1377 = shalt.err (!%p1374_p1)
}
 0x497   :  { %1242 = dma.vmem_to_hbm [thread:$0]  %s1237_s4, 4096, %s1967_s6, [#allocation4], %s1383_s7, %s1383_s7, %s1384_s8  }
 0x498   :  { %1380 = dma.done.wait [#allocation4], 4096  }
 0x499   :  { %1381 = vsyncadd [#allocation4], 4294963200 }
 0x49a   :  { %1246 = vsyncpa [#allocation3], 1 }
 0x49b   :  { %1247 = vsyncpa [#allocation4], 1 }

</bundles_post_ra>
